<compile_context>
chip_gen: v5e
topology: v5e:2x2
jax: 0.10.0
libtpu: 0.0.40
codegen_flags: <defaults>
</compile_context>

<pallas_src>
import functools

import jax
import jax.numpy as jnp
from jax import lax
from jax.experimental import pallas as pl
from jax.experimental.pallas import tpu as pltpu


def _volterra_kernel(*refs, ksize, pad, shift_radius, wm, enable):
    """One batch element per grid step.

    refs (enable=True):  xz_ref, xc_ref, w_ref, b_ref, o_ref, data_ref
    refs (enable=False): xz_ref,         w_ref, b_ref, o_ref, data_ref

    xz_ref  : (1, C_in, Lp + 2D) zero-padded, flattened-spatial input (f32)
    xc_ref  : (1, C_in, Lp + 2D) wrap-padded, flattened-spatial input (f32)
    w_ref   : (C_out, K) fused weights (bf16), K = ksize*ksize*C_in [+ C_in]
    b_ref   : (C_out, 1) fused bias (f32)
    o_ref   : (1, C_out, Lp) output over the padded spatial grid (f32)
    data_ref: (K, Lp) f32 scratch holding the fused [im2col | quadratic] matrix
    """
    if enable:
        xz_ref, xc_ref, w_ref, b_ref, o_ref, data_ref = refs
    else:
        xz_ref, w_ref, b_ref, o_ref, data_ref = refs

    c_in = xz_ref.shape[1]
    lp = o_ref.shape[2]
    d0 = (xz_ref.shape[2] - lp) // 2          # centre offset inside the super-pad

    # ---- F1 rows: im2col taps of the zero-padded image (static lane slices) --
    xz = xz_ref[0]                            # (C_in, Lp + 2D)
    t = 0
    for kh in range(ksize):
        for kw in range(ksize):
            sh = (kh - pad) * wm + (kw - pad)
            data_ref[pl.ds(t * c_in, c_in), :] = xz[:, d0 + sh: d0 + sh + lp]
            t += 1

    # ---- F2 rows: sum_{i<=j} Xi*Xj = (S^2 + Q)/2 on the wrap-padded image ----
    # (the 1/2 and the 1/count of the reference are folded into w_ref)
    if enable:
        xc = xc_ref[0]                        # (C_in, Lp + 2D)
        xc2 = xc * xc                         # squares stay in f32
        s = jnp.zeros((c_in, lp), jnp.float32)
        q = jnp.zeros((c_in, lp), jnp.float32)
        for dy in range(-shift_radius, shift_radius + 1):
            for dx in range(-shift_radius, shift_radius + 1):
                sh = dy * wm + dx
                s = s + xc[:, d0 + sh: d0 + sh + lp]
                q = q + xc2[:, d0 + sh: d0 + sh + lp]
        data_ref[pl.ds(t * c_in, c_in), :] = s * s + q

    # ---- single fused MXU matmul: (C_out, K) @ (K, Lp), bf16 in / f32 acc ----
    data = data_ref[...].astype(w_ref.dtype)
    out = jnp.dot(w_ref[...], data, preferred_element_type=jnp.float32)
    out = out + b_ref[...]                    # (C_out, 1) broadcast over lanes
    o_ref[...] = out[None].astype(o_ref.dtype)


def volterra_layer_2d(x_nchw, params, *, kernel_size=3, shift_radius=1, rank=1,
                      enable=True):
    """Pallas implementation of VolterraLayer2D.forward (input/output NCHW)."""
    W1 = params["w1"]          # (C_out, C_in, k, k)   linear_conv.weight
    b1 = params["b1"]          # (C_out,)              linear_conv.bias
    A = params["w2a_w"]        # (rank, C_out, C_in)   W2a[q].weight (1x1, squeezed)
    a = params["w2a_b"]        # (rank, C_out)         W2a[q].bias
    B = params["w2b_w"]        # (rank, C_out, C_out)  W2b[q].weight (1x1, squeezed)
    b = params["w2b_b"]        # (rank, C_out)         W2b[q].bias

    N, C_in, H, W = x_nchw.shape
    C_out = W1.shape[0]
    assert kernel_size % 2 == 1 and W1.shape[2] == kernel_size
    if enable:
        assert A.shape[0] == rank

    p = kernel_size // 2
    r = shift_radius
    m = max(p, r)                              # common halo for both terms
    Hm, Wm = H + 2 * m, W + 2 * m
    L = Hm * Wm
    Lp = ((L + 127) // 128) * 128              # lane-align the flattened spatial axis
    D = m * Wm + m                             # largest |flat shift| taken in-kernel

    x = x_nchw.astype(jnp.float32)

    def _flatten(v):                           # (N,C,Hm,Wm) -> (N,C,Lp+2D)
        v = v.reshape(N, C_in, L)
        v = jnp.pad(v, ((0, 0), (0, 0), (0, Lp - L)))
        return jnp.pad(v, ((0, 0), (0, 0), (D, D)))

    xz_s = _flatten(jnp.pad(x, ((0, 0), (0, 0), (m, m), (m, m))))           # zero pad
    xc_s = (_flatten(jnp.pad(x, ((0, 0), (0, 0), (m, m), (m, m)), mode="wrap"))
            if enable else None)                                            # wrap pad

    # fused weights: [ im2col(W1) | sum_q B_q A_q / (2*count) ]  -> (C_out, K)
    w1_part = jnp.transpose(W1, (0, 2, 3, 1)).reshape(
        C_out, kernel_size * kernel_size * C_in)
    if enable:
        n_off = (2 * r + 1) ** 2
        count = n_off * (n_off + 1) // 2
        w2_part = jnp.einsum("qop,qpc->oc", B, A) / (2.0 * count)
        w_fused = jnp.concatenate([w1_part, w2_part], axis=1)
        bias = b1 + jnp.einsum("qop,qp->o", B, a) + jnp.sum(b, axis=0)
    else:
        w_fused = w1_part
        bias = b1
    w_fused = w_fused.astype(jnp.bfloat16)     # bf16 MXU operands, f32 accumulation
    bias = bias.reshape(C_out, 1).astype(jnp.float32)
    K = w_fused.shape[1]

    kernel = functools.partial(_volterra_kernel, ksize=kernel_size, pad=p,
                               shift_radius=r, wm=Wm, enable=enable)

    x_spec = pl.BlockSpec((1, C_in, Lp + 2 * D), lambda n: (n, 0, 0))
    in_specs = [x_spec] + ([x_spec] if enable else []) + [
        pl.BlockSpec((C_out, K), lambda n: (0, 0)),
        pl.BlockSpec((C_out, 1), lambda n: (0, 0)),
    ]
    inputs = [xz_s] + ([xc_s] if enable else []) + [w_fused, bias]

    # NOTE: for full-size SwinIR feature maps, tile H with a halo (grid=(N, H//TH))
    # so the per-step working set stays inside v7x's 64 MiB VMEM; at these sizes a
    # whole image per grid step fits comfortably.
    out_flat = pl.pallas_call(
        kernel,
        out_shape=jax.ShapeDtypeStruct((N, C_out, Lp), jnp.float32),
        grid_spec=pltpu.PrefetchScalarGridSpec(
            num_scalar_prefetch=0,
            grid=(N,),
            in_specs=in_specs,
            out_specs=pl.BlockSpec((1, C_out, Lp), lambda n: (n, 0, 0)),
            scratch_shapes=[pltpu.VMEM((K, Lp), jnp.float32)],
        ),
        compiler_params=pltpu.CompilerParams(dimension_semantics=("parallel",)),
    )(*inputs)

    # crop the halo / lane padding and un-flatten back to NCHW
    out = out_flat[:, :, :L].reshape(N, C_out, Hm, Wm)
    return out[:, :, m:m + H, m:m + W]


def ref_forward(x_nchw, params, *, shift_radius=1, rank=1, enable=True):
    """Pure-JAX reference matching the PyTorch forward exactly (NCHW, f32)."""
    W1, b1 = params["w1"], params["b1"]
    A, a = params["w2a_w"], params["w2a_b"]
    B, b = params["w2b_w"], params["w2b_b"]
    F1 = lax.conv_general_dilated(x_nchw, W1, (1, 1), "SAME",
                                  dimension_numbers=("NCHW", "OIHW", "NCHW"))
    F1 = F1 + b1[None, :, None, None]
    if not enable:
        return F1
    offsets = [(dy, dx) for dy in range(-shift_radius, shift_radius + 1)
               for dx in range(-shift_radius, shift_radius + 1)]
    shifted = [jnp.roll(x_nchw, shift=s, axis=(2, 3)) for s in offsets]
    F2 = jnp.zeros_like(F1)
    count = 0
    for i in range(len(shifted)):
        for j in range(i, len(shifted)):
            prod = shifted[i] * shifted[j]
            for q in range(rank):
                y = jnp.einsum("oc,nchw->nohw", A[q], prod) + a[q][None, :, None, None]
                z = jnp.einsum("oc,nchw->nohw", B[q], y) + b[q][None, :, None, None]
                F2 = F2 + z
            count += 1
    F2 = F2 / count
    return F1 + F2


if __name__ == "__main__":
    key = jax.random.PRNGKey(0)
    N, C_in, C_out, H, W = 2, 4, 8, 16, 16
    rank = 2
    ks = jax.random.split(key, 7)
    x = jax.random.normal(ks[0], (N, C_in, H, W), jnp.float32)
    params = dict(
        w1=0.1 * jax.random.normal(ks[1], (C_out, C_in, 3, 3), jnp.float32),
        b1=0.1 * jax.random.normal(ks[2], (C_out,), jnp.float32),
        w2a_w=0.1 * jax.random.normal(ks[3], (rank, C_out, C_in), jnp.float32),
        w2a_b=0.1 * jax.random.normal(ks[4], (rank, C_out), jnp.float32),
        w2b_w=0.1 * jax.random.normal(ks[5], (rank, C_out, C_out), jnp.float32),
        w2b_b=0.1 * jax.random.normal(ks[6], (rank, C_out), jnp.float32),
    )

    # full Volterra path (enable=True)
    out = jax.block_until_ready(
        volterra_layer_2d(x, params, kernel_size=3, shift_radius=1, rank=rank, enable=True))
    ref = jax.block_until_ready(
        ref_forward(x, params, shift_radius=1, rank=rank, enable=True))
    assert out.shape == (N, C_out, H, W), out.shape
    err = float(jnp.max(jnp.abs(out - ref)))
    assert jnp.allclose(out, ref, atol=2e-2, rtol=2e-2), f"max abs err = {err}"

    # linear-only path (enable=False)
    out1 = jax.block_until_ready(
        volterra_layer_2d(x, params, kernel_size=3, shift_radius=1, rank=rank, enable=False))
    ref1 = jax.block_until_ready(
        ref_forward(x, params, shift_radius=1, rank=rank, enable=False))
    err1 = float(jnp.max(jnp.abs(out1 - ref1)))
    assert jnp.allclose(out1, ref1, atol=2e-2, rtol=2e-2), f"max abs err (F1-only) = {err1}"

    print("KERNEL_OK")
</pallas_src>

<mosaic_0001>
module attributes {stable_mosaic.version = 11 : i64} {
  func.func @_volterra_kernel(%arg0: i32, %arg1: memref<1x4x422xf32, #tpu.memory_space<vmem>>, %arg2: memref<1x4x422xf32, #tpu.memory_space<vmem>>, %arg3: memref<8x40xbf16, #tpu.memory_space<vmem>>, %arg4: memref<8x1xf32, #tpu.memory_space<vmem>>, %arg5: memref<1x8x384xf32, #tpu.memory_space<vmem>>, %arg6: memref<40x384xf32, #tpu.memory_space<vmem>>) attributes {dimension_semantics = [#tpu.dimension_semantics<parallel>], iteration_bounds = array<i64: 2>, scalar_prefetch = 0 : i64, scratch_operands = 1 : i64, tpu.core_type = #tpu.core_type<tc>, window_params = [{transform_indices = @transform_0, window_bounds = array<i64: 1, 4, 422>}, {transform_indices = @transform_1, window_bounds = array<i64: 1, 4, 422>}, {pipeline_mode = #tpu.pipeline_mode<synchronous>, transform_indices = @transform_2, window_bounds = array<i64: 8, 40>}, {pipeline_mode = #tpu.pipeline_mode<synchronous>, transform_indices = @transform_3, window_bounds = array<i64: 8, 1>}, {transform_indices = @transform_4, window_bounds = array<i64: 1, 8, 384>}]} {
    %c0 = arith.constant 0 : index
    %c0_0 = arith.constant 0 : index
    %c0_1 = arith.constant 0 : index
    %0 = vector.load %arg1[%c0, %c0_0, %c0_1] : memref<1x4x422xf32, #tpu.memory_space<vmem>>, vector<1x4x422xf32>
    %1 = vector.shape_cast %0 : vector<1x4x422xf32> to vector<4x422xf32>
    %2 = vector.extract_strided_slice %1 {offsets = [0, 0], sizes = [4, 384], strides = [1, 1]} : vector<4x422xf32> to vector<4x384xf32>
    %c0_2 = arith.constant 0 : index
    %c0_3 = arith.constant 0 : index
    %3 = vector.load %arg6[%c0_2, %c0_3] : memref<40x384xf32, #tpu.memory_space<vmem>>, vector<4x384xf32>
    tpu.vector_store %arg6[%c0_2, %c0_3], %2 {strides = array<i32>} : memref<40x384xf32, #tpu.memory_space<vmem>>, vector<4x384xf32>,
    %4 = vector.extract_strided_slice %1 {offsets = [0, 1], sizes = [4, 384], strides = [1, 1]} : vector<4x422xf32> to vector<4x384xf32>
    %c4 = arith.constant 4 : index
    %c0_4 = arith.constant 0 : index
    %5 = vector.load %arg6[%c4, %c0_4] : memref<40x384xf32, #tpu.memory_space<vmem>>, vector<4x384xf32>
    tpu.vector_store %arg6[%c4, %c0_4], %4 {strides = array<i32>} : memref<40x384xf32, #tpu.memory_space<vmem>>, vector<4x384xf32>,
    %6 = vector.extract_strided_slice %1 {offsets = [0, 2], sizes = [4, 384], strides = [1, 1]} : vector<4x422xf32> to vector<4x384xf32>
    %c8 = arith.constant 8 : index
    %c0_5 = arith.constant 0 : index
    %7 = vector.load %arg6[%c8, %c0_5] : memref<40x384xf32, #tpu.memory_space<vmem>>, vector<4x384xf32>
    tpu.vector_store %arg6[%c8, %c0_5], %6 {strides = array<i32>} : memref<40x384xf32, #tpu.memory_space<vmem>>, vector<4x384xf32>,
    %8 = vector.extract_strided_slice %1 {offsets = [0, 18], sizes = [4, 384], strides = [1, 1]} : vector<4x422xf32> to vector<4x384xf32>
    %c12 = arith.constant 12 : index
    %c0_6 = arith.constant 0 : index
    %9 = vector.load %arg6[%c12, %c0_6] : memref<40x384xf32, #tpu.memory_space<vmem>>, vector<4x384xf32>
    tpu.vector_store %arg6[%c12, %c0_6], %8 {strides = array<i32>} : memref<40x384xf32, #tpu.memory_space<vmem>>, vector<4x384xf32>,
    %10 = vector.extract_strided_slice %1 {offsets = [0, 19], sizes = [4, 384], strides = [1, 1]} : vector<4x422xf32> to vector<4x384xf32>
    %c16 = arith.constant 16 : index
    %c0_7 = arith.constant 0 : index
    %11 = vector.load %arg6[%c16, %c0_7] : memref<40x384xf32, #tpu.memory_space<vmem>>, vector<4x384xf32>
    tpu.vector_store %arg6[%c16, %c0_7], %10 {strides = array<i32>} : memref<40x384xf32, #tpu.memory_space<vmem>>, vector<4x384xf32>,
    %12 = vector.extract_strided_slice %1 {offsets = [0, 20], sizes = [4, 384], strides = [1, 1]} : vector<4x422xf32> to vector<4x384xf32>
    %c20 = arith.constant 20 : index
    %c0_8 = arith.constant 0 : index
    %13 = vector.load %arg6[%c20, %c0_8] : memref<40x384xf32, #tpu.memory_space<vmem>>, vector<4x384xf32>
    tpu.vector_store %arg6[%c20, %c0_8], %12 {strides = array<i32>} : memref<40x384xf32, #tpu.memory_space<vmem>>, vector<4x384xf32>,
    %14 = vector.extract_strided_slice %1 {offsets = [0, 36], sizes = [4, 384], strides = [1, 1]} : vector<4x422xf32> to vector<4x384xf32>
    %c24 = arith.constant 24 : index
    %c0_9 = arith.constant 0 : index
    %15 = vector.load %arg6[%c24, %c0_9] : memref<40x384xf32, #tpu.memory_space<vmem>>, vector<4x384xf32>
    tpu.vector_store %arg6[%c24, %c0_9], %14 {strides = array<i32>} : memref<40x384xf32, #tpu.memory_space<vmem>>, vector<4x384xf32>,
    %16 = vector.extract_strided_slice %1 {offsets = [0, 37], sizes = [4, 384], strides = [1, 1]} : vector<4x422xf32> to vector<4x384xf32>
    %c28 = arith.constant 28 : index
    %c0_10 = arith.constant 0 : index
    %17 = vector.load %arg6[%c28, %c0_10] : memref<40x384xf32, #tpu.memory_space<vmem>>, vector<4x384xf32>
    tpu.vector_store %arg6[%c28, %c0_10], %16 {strides = array<i32>} : memref<40x384xf32, #tpu.memory_space<vmem>>, vector<4x384xf32>,
    %18 = vector.extract_strided_slice %1 {offsets = [0, 38], sizes = [4, 384], strides = [1, 1]} : vector<4x422xf32> to vector<4x384xf32>
    %c32 = arith.constant 32 : index
    %c0_11 = arith.constant 0 : index
    %19 = vector.load %arg6[%c32, %c0_11] : memref<40x384xf32, #tpu.memory_space<vmem>>, vector<4x384xf32>
    tpu.vector_store %arg6[%c32, %c0_11], %18 {strides = array<i32>} : memref<40x384xf32, #tpu.memory_space<vmem>>, vector<4x384xf32>,
    %c0_12 = arith.constant 0 : index
    %c0_13 = arith.constant 0 : index
    %c0_14 = arith.constant 0 : index
    %20 = vector.load %arg2[%c0_12, %c0_13, %c0_14] : memref<1x4x422xf32, #tpu.memory_space<vmem>>, vector<1x4x422xf32>
    %21 = vector.shape_cast %20 : vector<1x4x422xf32> to vector<4x422xf32>
    %22 = arith.mulf %21, %21 : vector<4x422xf32>
    %cst = arith.constant 0.000000e+00 : f32
    %23 = vector.broadcast %cst : f32 to vector<4x384xf32>
    %cst_15 = arith.constant 0.000000e+00 : f32
    %24 = vector.broadcast %cst_15 : f32 to vector<4x384xf32>
    %25 = vector.extract_strided_slice %21 {offsets = [0, 0], sizes = [4, 384], strides = [1, 1]} : vector<4x422xf32> to vector<4x384xf32>
    %26 = arith.addf %23, %25 : vector<4x384xf32>
    %27 = vector.extract_strided_slice %22 {offsets = [0, 0], sizes = [4, 384], strides = [1, 1]} : vector<4x422xf32> to vector<4x384xf32>
    %28 = arith.addf %24, %27 : vector<4x384xf32>
    %29 = vector.extract_strided_slice %21 {offsets = [0, 1], sizes = [4, 384], strides = [1, 1]} : vector<4x422xf32> to vector<4x384xf32>
    %30 = arith.addf %26, %29 : vector<4x384xf32>
    %31 = vector.extract_strided_slice %22 {offsets = [0, 1], sizes = [4, 384], strides = [1, 1]} : vector<4x422xf32> to vector<4x384xf32>
    %32 = arith.addf %28, %31 : vector<4x384xf32>
    %33 = vector.extract_strided_slice %21 {offsets = [0, 2], sizes = [4, 384], strides = [1, 1]} : vector<4x422xf32> to vector<4x384xf32>
    %34 = arith.addf %30, %33 : vector<4x384xf32>
    %35 = vector.extract_strided_slice %22 {offsets = [0, 2], sizes = [4, 384], strides = [1, 1]} : vector<4x422xf32> to vector<4x384xf32>
    %36 = arith.addf %32, %35 : vector<4x384xf32>
    %37 = vector.extract_strided_slice %21 {offsets = [0, 18], sizes = [4, 384], strides = [1, 1]} : vector<4x422xf32> to vector<4x384xf32>
    %38 = arith.addf %34, %37 : vector<4x384xf32>
    %39 = vector.extract_strided_slice %22 {offsets = [0, 18], sizes = [4, 384], strides = [1, 1]} : vector<4x422xf32> to vector<4x384xf32>
    %40 = arith.addf %36, %39 : vector<4x384xf32>
    %41 = vector.extract_strided_slice %21 {offsets = [0, 19], sizes = [4, 384], strides = [1, 1]} : vector<4x422xf32> to vector<4x384xf32>
    %42 = arith.addf %38, %41 : vector<4x384xf32>
    %43 = vector.extract_strided_slice %22 {offsets = [0, 19], sizes = [4, 384], strides = [1, 1]} : vector<4x422xf32> to vector<4x384xf32>
    %44 = arith.addf %40, %43 : vector<4x384xf32>
    %45 = vector.extract_strided_slice %21 {offsets = [0, 20], sizes = [4, 384], strides = [1, 1]} : vector<4x422xf32> to vector<4x384xf32>
    %46 = arith.addf %42, %45 : vector<4x384xf32>
    %47 = vector.extract_strided_slice %22 {offsets = [0, 20], sizes = [4, 384], strides = [1, 1]} : vector<4x422xf32> to vector<4x384xf32>
    %48 = arith.addf %44, %47 : vector<4x384xf32>
    %49 = vector.extract_strided_slice %21 {offsets = [0, 36], sizes = [4, 384], strides = [1, 1]} : vector<4x422xf32> to vector<4x384xf32>
    %50 = arith.addf %46, %49 : vector<4x384xf32>
    %51 = vector.extract_strided_slice %22 {offsets = [0, 36], sizes = [4, 384], strides = [1, 1]} : vector<4x422xf32> to vector<4x384xf32>
    %52 = arith.addf %48, %51 : vector<4x384xf32>
    %53 = vector.extract_strided_slice %21 {offsets = [0, 37], sizes = [4, 384], strides = [1, 1]} : vector<4x422xf32> to vector<4x384xf32>
    %54 = arith.addf %50, %53 : vector<4x384xf32>
    %55 = vector.extract_strided_slice %22 {offsets = [0, 37], sizes = [4, 384], strides = [1, 1]} : vector<4x422xf32> to vector<4x384xf32>
    %56 = arith.addf %52, %55 : vector<4x384xf32>
    %57 = vector.extract_strided_slice %21 {offsets = [0, 38], sizes = [4, 384], strides = [1, 1]} : vector<4x422xf32> to vector<4x384xf32>
    %58 = arith.addf %54, %57 : vector<4x384xf32>
    %59 = vector.extract_strided_slice %22 {offsets = [0, 38], sizes = [4, 384], strides = [1, 1]} : vector<4x422xf32> to vector<4x384xf32>
    %60 = arith.addf %56, %59 : vector<4x384xf32>
    %61 = arith.mulf %58, %58 : vector<4x384xf32>
    %62 = arith.addf %61, %60 : vector<4x384xf32>
    %c36 = arith.constant 36 : index
    %c0_16 = arith.constant 0 : index
    %63 = vector.load %arg6[%c36, %c0_16] : memref<40x384xf32, #tpu.memory_space<vmem>>, vector<4x384xf32>
    tpu.vector_store %arg6[%c36, %c0_16], %62 {strides = array<i32>} : memref<40x384xf32, #tpu.memory_space<vmem>>, vector<4x384xf32>,
    %c0_17 = arith.constant 0 : index
    %c0_18 = arith.constant 0 : index
    %64 = vector.load %arg6[%c0_17, %c0_18] : memref<40x384xf32, #tpu.memory_space<vmem>>, vector<40x384xf32>
    %65 = arith.truncf %64 : vector<40x384xf32> to vector<40x384xbf16>
    %c0_19 = arith.constant 0 : index
    %c0_20 = arith.constant 0 : index
    %66 = vector.load %arg3[%c0_19, %c0_20] : memref<8x40xbf16, #tpu.memory_space<vmem>>, vector<8x40xbf16>
    %cst_21 = arith.constant dense<0.000000e+00> : vector<8x384xf32>
    %67 = tpu.matmul %66, %65, %cst_21 {dimension_numbers = #tpu.dot_dimension_numbers<[1], [0], [0], [1], [0, 0, 1, 1], [], []>} : vector<8x40xbf16>, vector<40x384xbf16>, vector<8x384xf32> -> vector<8x384xf32>
    %c0_22 = arith.constant 0 : index
    %c0_23 = arith.constant 0 : index
    %68 = vector.load %arg4[%c0_22, %c0_23] : memref<8x1xf32, #tpu.memory_space<vmem>>, vector<8x1xf32>
    %69 = vector.broadcast %68 : vector<8x1xf32> to vector<8x384xf32>
    %70 = arith.addf %67, %69 : vector<8x384xf32>
    %71 = vector.shape_cast %70 : vector<8x384xf32> to vector<1x8x384xf32>
    %c0_24 = arith.constant 0 : index
    %c0_25 = arith.constant 0 : index
    %c0_26 = arith.constant 0 : index
    %72 = vector.load %arg5[%c0_24, %c0_25, %c0_26] : memref<1x8x384xf32, #tpu.memory_space<vmem>>, vector<1x8x384xf32>
    tpu.vector_store %arg5[%c0_24, %c0_25, %c0_26], %71 {strides = array<i32>} : memref<1x8x384xf32, #tpu.memory_space<vmem>>, vector<1x8x384xf32>,
    return
  }
  func.func @transform_0(%arg0: i32) -> (i32, i32, i32) {
    %c0_i32 = arith.constant 0 : i32
    %c0_i32_0 = arith.constant 0 : i32
    %c0_i32_1 = arith.constant 0 : i32
    return %arg0, %c0_i32, %c0_i32_0 : i32, i32, i32
  }
  func.func @transform_1(%arg0: i32) -> (i32, i32, i32) {
    %c0_i32 = arith.constant 0 : i32
    %c0_i32_0 = arith.constant 0 : i32
    %c0_i32_1 = arith.constant 0 : i32
    return %arg0, %c0_i32, %c0_i32_0 : i32, i32, i32
  }
  func.func @transform_2(%arg0: i32) -> (i32, i32) {
    %c0_i32 = arith.constant 0 : i32
    %c0_i32_0 = arith.constant 0 : i32
    %c0_i32_1 = arith.constant 0 : i32
    return %c0_i32, %c0_i32_0 : i32, i32
  }
  func.func @transform_3(%arg0: i32) -> (i32, i32) {
    %c0_i32 = arith.constant 0 : i32
    %c0_i32_0 = arith.constant 0 : i32
    %c0_i32_1 = arith.constant 0 : i32
    return %c0_i32, %c0_i32_0 : i32, i32
  }
  func.func @transform_4(%arg0: i32) -> (i32, i32, i32) {
    %c0_i32 = arith.constant 0 : i32
    %c0_i32_0 = arith.constant 0 : i32
    %c0_i32_1 = arith.constant 0 : i32
    return %arg0, %c0_i32, %c0_i32_0 : i32, i32, i32
  }
}

</mosaic_0001>

<bundles_post_ra>
// kernel: tpu_custom_call.1
= control target key start
LH: loop header
LB: loop body
LE: loop exit
PB: predicated region body
PF: predicated region fallthrough
CT: control target
= control target key end

     0   :  { %s1721_s0 = inlined_call_operand.hbm [shape: f32[2,4,422], index: 0, kind: input, shape index: {}]   ;;  %s1722_s1 = inlined_call_operand.hbm [shape: f32[2,4,422], index: 1, kind: input, shape index: {}]   ;;  %s1723_s2 = inlined_call_operand.vmem [shape: bf16[8,40], index: 2, kind: input, shape index: {}]   ;;  %s1724_s3 = inlined_call_operand.vmem [shape: f32[8,1], index: 3, kind: input, shape index: {}]   ;;  %s1725_s4 = inlined_call_operand.hbm [shape: f32[2,8,384], index: 4, kind: output, shape index: {}]  }
   0x1   :  { %1726 = sst [smem:[#allocation12_spill]] %s1721_s0 }
   0x2   :  { %9 = vsyncpa [#allocation4], 0 }
   0x3   :  { %11 = vsyncpa [#allocation4 + $0x1], 0 }
   0x4   :  { %12 = vsyncpa [#allocation7], 0 }
   0x5   :  { %14 = vsyncpa [#allocation7 + $0x1], 0 }
   0x6   :  { %15 = vsyncpa [#allocation5], 0 }
   0x7   :  { %17 = vsyncpa [#allocation5 + $0x1], 0  ;;  %s1163_s15 = smov 0   ;;  %s1165_s16 = smov 0  }
   0x8   :  { %s1167_s17 = smov 0   ;;  %s1169_s18 = smov 0  }
   0x9 LB: > { %s1184_s19 = sadd.s32 4294967295, %s1127_s18   ;;  %s913_s20 = sadd.s32 4294967294, %s1127_s18   ;;  %s1127_s18 = sphi %s1169_s18, %s1738_s18   ;;  %s1123_s17 = sphi %s1167_s17, %s1737_s17   ;;  %s1119_s16 = sphi %s1165_s16, %s1736_s16   ;;  %s1115_s15 = sphi %s1163_s15, %s1735_s15  }
   0xa   : > { %s1188_s21 = sadd.s32 1, %s1127_s18   ;;  %s30_s22 = sadd.s32 1, %s1123_s17 }
   0xb   : > { %s27_s23 = ssub.s32 %s1127_s18, %s1188_s21  ;;  %p37_p0 = scmp.ne.s32.totalorder %s1123_s17, %s1119_s16 }
   0xc   : > { %p28_p1 = scmp.eq.s32.totalorder %s27_s23, 0  ;;  %p38_p2 = scmp.eq.s32.totalorder %s1127_s18, 0 }
   0xd   : > { %p43_p3 = scmp.ne.s32.totalorder %s1119_s16, %s1115_s15  ;;  %p44_p4 = scmp.eq.s32.totalorder %s1184_s19, 0 }
   0xe   : > { %s1200_s24 = scalar_select %p28_p1, %s1123_s17, %s30_s22  }
   0xf   : > { %p1202_p5 = por %p38_p2, %p37_p0  ;;  %p1206_p6 = por %p44_p4, %p43_p3 }
  0x10   : > { %p135_p7 = scmp.eq.s32.totalorder %s1184_s19, 1  ;;  %p141_p8 = scmp.eq.s32.totalorder %s913_s20, 1 }
  0x11   : > { %p952_p10 = scmp.lt.s32.totalorder %s1127_s18, 2  ;;  %s1222_s29 = sand.u32 1, %s1123_s17  }
  0x12   : > { %p1213_p11 = por %p135_p7, %p37_p0  ;;  %p1217_p12 = por %p141_p8, %p43_p3 }
  0x13   : > { %s931_s30 = sshll.u32 %s1127_s18, 4  ;;  %s916_s5 = sshll.u32 %s1222_s29, 4 }
  0x14   : > { %s1731_s0 = sld [smem:[#allocation12_spill]]  ;;  %s171_s10 = scalar_lea.vmem [#allocation3], %s916_s5 }
  0x15   : > { %s180_s11 = sshll.u32 %s171_s10, 4  ;;  %p1231_p13 = pnand %p952_p10, %p1202_p5  ;;  %s181_s11 = int_to_ptr.vmem [resolvable:$true] %s180_s11 }
  0x16   : > { %p922_p0 = scmp.ge.s32.totalorder %s1127_s18, 1  ;;  %p205_p1 = scmp.lt.s32.totalorder %s1127_s18, 3 }
  0x17   : > { %s168_s13 = scalar_lea.sflag [#allocation4], %s1222_s29  ;;  %p1001_p3 = pneg %p1231_p13 }
  0x1a   : > { %s176_s8 = scalar_lea.hbm %s1731_s0, %s931_s30  ;;  %s1004_s25 = scalar_lea.hbm %s1731_s0, 32 }
  0x1b   : > { %s178_s9 = sshll.u32 %s176_s8, 4  ;;  %s179_s9 = int_to_ptr.hbm [resolvable:$true] %s178_s9 }
  0x1c   : > { %s997_s14 = sshra.s32 %s179_s9, 4  ;;  %s998_s14 = int_to_ptr.hbm [resolvable:$true] %s997_s14 }
  0x1d   : > { %s999_s20 = scalar_lea.hbm %s998_s14, 16  ;;  %p1005_p5 = scmp.lt.s32.totalorder %s998_s14, %s1731_s0 }
  0x1e   : > { %p1000_p2 = scmp.ne.s32.totalorder %s998_s14, %s999_s20  ;;  %p1006_p8 = scmp.lt.s32.totalorder %s1004_s25, %s999_s20 }
  0x20   : > { %p1002_p4 = pnand %p1001_p3, %p1000_p2  ;;  %p1007_p10 = por %p1006_p8, %p1005_p5 }
  0x22   : > { %p1003_p7 = pneg %p1002_p4 }
  0x24   : > { %p1008_p9 = pnand %p1007_p10, %p1003_p7 }
  0x26   : > { %1011 = shalt.err (!%p1008_p9)
}
  0x27   : > { %944 = dma.hbm_to_vmem [thread:$0]  (!%p1231_p13), %s179_s9, 256, %s181_s11, %s168_s13  }
  0x28   : > { %p1255_p2 = pnand %p922_p0, %p205_p1  ;;  %s196_s14 = scalar_lea.hbm %s1722_s1, %s931_s30 }
  0x29   : > { %s198_s20 = sshll.u32 %s196_s14, 4  ;;  %s191_s23 = scalar_lea.vmem [#allocation6], %s916_s5  ;;  %s199_s20 = int_to_ptr.hbm [resolvable:$true] %s198_s20 }
  0x2a   : > { %s200_s25 = sshll.u32 %s191_s23, 4  ;;  %s188_s6 = scalar_lea.sflag [#allocation7], %s1222_s29  ;;  %s201_s25 = int_to_ptr.vmem [resolvable:$true] %s200_s25 }
  0x2b   : > { %s1027_s7 = sshra.s32 %s199_s20, 4  ;;  %s1034_s13 = scalar_lea.hbm %s1722_s1, 32  ;;  %s1028_s7 = int_to_ptr.hbm [resolvable:$true] %s1027_s7 }
  0x2c   : > { %s1029_s0 = scalar_lea.hbm %s1028_s7, 16  ;;  %p1035_p4 = scmp.lt.s32.totalorder %s1028_s7, %s1722_s1 }
  0x2d   : > { %p1030_p9 = scmp.ne.s32.totalorder %s1028_s7, %s1029_s0  ;;  %p1036_p7 = scmp.lt.s32.totalorder %s1034_s13, %s1029_s0 }
  0x2f   : > { %p1032_p0 = pnand %p1030_p9, %p1001_p3  ;;  %p1037_p5 = por %p1036_p7, %p1035_p4 }
  0x31   : > { %p1033_p1 = pneg %p1032_p0 }
  0x33   : > { %p1038_p8 = pnand %p1037_p5, %p1033_p1 }
  0x35   : > { %1041 = shalt.err (!%p1038_p8)
}
  0x36   : > { %947 = dma.hbm_to_vmem [thread:$0]  (!%p1231_p13), %s199_s20, 256, %s201_s25, %s188_s6  }
  0x37   : > { %209 = sbr.rel (%p1255_p2) target bundleno = 497 (0x1f1), region = 36  ;;  %s1277_s29 = sand.u32 (!%p1255_p2), 1, %s1119_s16  }
  0x38   : > { %s923_s5 = sshll.u32 (!%p1255_p2), %s1277_s29, 4  ;;  %s212_s22 = scalar_lea.sflag (!%p1255_p2), [#allocation4], %s1277_s29 }
  0x39   : > { %s215_s14 = scalar_lea.vmem (!%p1255_p2), [#allocation3], %s923_s5 }
  0x3c   : > { %1102 = dma.done.wait (%p1206_p6), %s212_s22, 256  }
  0x3d   : > { %1104 = vsyncadd (%p1206_p6), %s212_s22, 4294967040  ;;  %s222_s0 = scalar_lea.sflag [#allocation7], %s1277_s29  ;;  %s225_s12 = scalar_lea.vmem [#allocation6], %s923_s5 }
  0x3e   : > { %1106 = dma.done.wait (%p1206_p6), %s222_s0, 256  }
  0x3f   : > { %1108 = vsyncadd (%p1206_p6), %s222_s0, 4294967040  ;;  %v1290_v0 = vld [vmem:[%s225_s12 + $0x8] sm:$0xff]  ;;  %s1129_s8 = smov 110   ;;  %s1130_s20 = smov 126   ;;  %v1305_v3 = vld [vmem:[%s225_s12] sm:$0xff]  ;;  %vm493_vm0 = vcmask 1043456  }
  0x40   : > { %v1292_v1 = vld [vmem:[%s215_s14 + $0x8] sm:$0xff]  ;;  %544 = vrot.lane.b32.xlu2 %v1290_v0, %s1129_s8  ;;  %518 = vrot.lane.b32.xlu1 %v1290_v0, %s1130_s20  ;;  %s1131_s23 = smov 127   ;;  %v1303_v2 = vmul.f32 %v1290_v0, %v1290_v0  ;;  %v1312_v5 = vld [vmem:[%s215_s14] sm:$0xff]  ;;  %v1319_v6 = vmul.f32 %v1305_v3, %v1305_v3  ;;  %s1132_s26 = smov 109   ;;  %vm289_vm1 = vcmask 1039360   ;;  %vm314_vm2 = vcmask 1031168  }
  0x41   : > { %263 = vst [vmem:[#allocation1 + $0x10] ss:$2 sm:$0xff] %v1292_v1  ;;  %489 = vrot.lane.b32.xlu0 %v1290_v0, %s1131_s23  ;;  %s1133_s25 = smov 108   ;;  %s1134_s6 = smov 92   ;;  %vm340_vm3 = vcmask 900096   ;;  %vm365_vm4 = vcmask 891904  }
  0x42   : > { %261 = vst [vmem:[#allocation1] ss:$2 sm:$0xff] %v1312_v5  ;;  %s1135_s7 = smov 91   ;;  %s1136_s9 = smov 90   ;;  %vm391_vm5 = vcmask 883712   ;;  %vm416_vm6 = vcmask 752640  }
  0x43   : > { %vm442_vm7 = vcmask 744448   ;;  %vm467_vm8 = vcmask 736256   ;;  %vm748_vm9 = vcmask 326656   ;;  %s933_s5 = smul.u32 24, %s1277_s29 }
  0x44   : > { %s934_s14 = smul.u32 24, %s1184_s19 }
  0x45   : > { %s255_s22 = scalar_lea.vmem [#allocation8], %s933_s5 }
  0x48   : > { %v266_v4 = vld.sshfl [vmem:[#allocation1 + $0x10] sm:$0xff pattern:$0x75316420]  ;;  %531 = vrot.lane.b32.xlu1 %v1303_v2, %s1130_s20  ;;  %487 = vrot.lane.b32.xlu2 %v1305_v3, %s1131_s23 }
  0x49   : > { %276 = vst [vmem:[#allocation1 + $0x11] ss:$2 sm:$0xff] %v1292_v1  ;;  %505 = vrot.lane.b32.xlu0 %v1303_v2, %s1131_s23  ;;  %v264_v9 = vld.sshfl [vmem:[#allocation1] sm:$0xff pattern:$0x75316420] }
  0x4a   : > { %272 = vst [vmem:[#allocation2 + $0x58] sm:$0xf] %v266_v4  ;;  %v265_v10 = vld.sshfl [vmem:[#allocation1 + $0x8] sm:$0xff pattern:$0x75316420] }
  0x4b   : > { %274 = vst [vmem:[#allocation1 + $0x1] ss:$2 sm:$0xff] %v1312_v5 }
  0x4c   : > { %270 = vst [vmem:[#allocation2 + $0x30] sm:$0xf] %v264_v9 }
  0x4d   : > { %271 = vst [vmem:[#allocation2] sm:$0xf] %v265_v10 }
  0x50   : > { %v1321_v7 = vld.sshfl [vmem:[#allocation1 + $0x10] sm:$0xff pattern:$0x75316420]  ;;  %v1323_v8 = vld.sshfl [vmem:[#allocation1 + $0x18] sm:$0xff pattern:$0x75316420]  ;;  %570 = vrot.lane.b32.xlu1 %v1290_v0, %s1132_s26  ;;  %503 = vrot.lane.b32.xlu2 %v1319_v6, %s1131_s23 }
  0x51   : > { %301 = vst [vmem:[#allocation1 + $0x10] ss:$2 sm:$0xff] %v1292_v1  ;;  %557 = vrot.lane.b32.xlu0 %v1303_v2, %s1129_s8 }
  0x52   : > { %v1344_v13 = vld.sshfl [vmem:[#allocation1] sm:$0xff pattern:$0x75316420]  ;;  %v1346_v14 = vld.sshfl [vmem:[#allocation1 + $0x8] sm:$0xff pattern:$0x75316420] }
  0x53   : > { %299 = vst [vmem:[#allocation1] ss:$2 sm:$0xff] %v1312_v5 }
  0x58   : > { %v1333_v11 = vld.sshfl [vmem:[#allocation1 + $0x10] sm:$0xff pattern:$0x75316420]  ;;  %v1335_v12 = vld.sshfl [vmem:[#allocation1 + $0x18] sm:$0xff pattern:$0x75316420]  ;;  %583 = vrot.lane.b32.xlu1 %v1303_v2, %s1132_s26  ;;  %596 = vrot.lane.b32.xlu2 %v1290_v0, %s1133_s25 }
  0x59   : > { %327 = vst [vmem:[#allocation1 + $0x11] ss:$2 sm:$0xff] %v1292_v1  ;;  %516 = vrot.lane.b32.xlu0 %v1305_v3, %s1130_s20 }
  0x5a   : > { %v1360_v17 = vld.sshfl [vmem:[#allocation1] sm:$0xff pattern:$0x75316420]  ;;  %v1362_v18 = vld.sshfl [vmem:[#allocation1 + $0x8] sm:$0xff pattern:$0x75316420] }
  0x5b   : > { %325 = vst [vmem:[#allocation1 + $0x1] ss:$2 sm:$0xff] %v1312_v5 }
  0x60   : > { %v1349_v15 = vld.sshfl [vmem:[#allocation1 + $0x10] sm:$0xff pattern:$0x75316420]  ;;  %v1351_v16 = vld.sshfl [vmem:[#allocation1 + $0x18] sm:$0xff pattern:$0x75316420]  ;;  %542 = vrot.lane.b32.xlu1 %v1305_v3, %s1129_s8  ;;  %609 = vrot.lane.b32.xlu2 %v1303_v2, %s1133_s25 }
  0x61   : > { %352 = vst [vmem:[#allocation1 + $0x10] ss:$2 sm:$0xff] %v1292_v1  ;;  %529 = vrot.lane.b32.xlu0 %v1319_v6, %s1130_s20 }
  0x62   : > { %v1372_v21 = vld.sshfl [vmem:[#allocation1] sm:$0xff pattern:$0x75316420]  ;;  %v1374_v22 = vld.sshfl [vmem:[#allocation1 + $0x8] sm:$0xff pattern:$0x75316420] }
  0x63   : > { %350 = vst [vmem:[#allocation1] ss:$2 sm:$0xff] %v1312_v5 }
  0x68   : > { %v355_v19 = vld.sshfl [vmem:[#allocation1 + $0x10] sm:$0xff pattern:$0x75316420]  ;;  %v356_v20 = vld.sshfl [vmem:[#allocation1 + $0x18] sm:$0xff pattern:$0x75316420]  ;;  %555 = vrot.lane.b32.xlu1 %v1319_v6, %s1129_s8  ;;  %568 = vrot.lane.b32.xlu2 %v1305_v3, %s1132_s26 }
  0x69   : > { %378 = vst [vmem:[#allocation1 + $0x11] ss:$2 sm:$0xff] %v1292_v1  ;;  %622 = vrot.lane.b32.xlu0 %v1290_v0, %s1134_s6 }
  0x6a   : > { %v353_v25 = vld.sshfl [vmem:[#allocation1] sm:$0xff pattern:$0x75316420]  ;;  %v1384_v26 = vld.sshfl [vmem:[#allocation1 + $0x8] sm:$0xff pattern:$0x75316420] }
  0x6b   : > { %376 = vst [vmem:[#allocation1 + $0x1] ss:$2 sm:$0xff] %v1312_v5 }
  0x70   : > { %v381_v23 = vld.sshfl [vmem:[#allocation1 + $0x10] sm:$0xff pattern:$0x75316420]  ;;  %v382_v24 = vld.sshfl [vmem:[#allocation1 + $0x18] sm:$0xff pattern:$0x75316420]  ;;  %648 = vrot.lane.b32.xlu1 %v1290_v0, %s1135_s7  ;;  %581 = vrot.lane.b32.xlu2 %v1319_v6, %s1132_s26 }
  0x71   : > { %403 = vst [vmem:[#allocation1 + $0x10] ss:$2 sm:$0xff] %v1292_v1  ;;  %635 = vrot.lane.b32.xlu0 %v1303_v2, %s1134_s6 }
  0x72   : > { %v379_v29 = vld.sshfl [vmem:[#allocation1] sm:$0xff pattern:$0x75316420]  ;;  %v380_v30 = vld.sshfl [vmem:[#allocation1 + $0x8] sm:$0xff pattern:$0x75316420] }
  0x73   : > { %401 = vst [vmem:[#allocation1] ss:$2 sm:$0xff] %v1312_v5 }
  0x78   : > { %v406_v27 = vld.sshfl [vmem:[#allocation1 + $0x10] sm:$0xff pattern:$0x75316420]  ;;  %v407_v28 = vld.sshfl [vmem:[#allocation1 + $0x18] sm:$0xff pattern:$0x75316420]  ;;  %661 = vrot.lane.b32.xlu1 %v1303_v2, %s1135_s7  ;;  %674 = vrot.lane.b32.xlu2 %v1290_v0, %s1136_s9 }
  0x79   : > { %429 = vst [vmem:[#allocation1 + $0x11] ss:$2 sm:$0xff] %v1292_v1  ;;  %594 = vrot.lane.b32.xlu0 %v1305_v3, %s1133_s25 }
  0x7a   : > { %v1402_v33 = vld.sshfl [vmem:[#allocation1] sm:$0xff pattern:$0x75316420]  ;;  %v405_v34 = vld.sshfl [vmem:[#allocation1 + $0x8] sm:$0xff pattern:$0x75316420] }
  0x7b   : > { %427 = vst [vmem:[#allocation1 + $0x1] ss:$2 sm:$0xff] %v1312_v5 }
  0x80   : > { %v432_v31 = vld.sshfl [vmem:[#allocation1 + $0x10] sm:$0xff pattern:$0x75316420]  ;;  %v433_v32 = vld.sshfl [vmem:[#allocation1 + $0x18] sm:$0xff pattern:$0x75316420]  ;;  %620 = vrot.lane.b32.xlu1 %v1305_v3, %s1134_s6  ;;  %687 = vrot.lane.b32.xlu2 %v1303_v2, %s1136_s9 }
  0x81   : > { %454 = vst [vmem:[#allocation1 + $0x10] ss:$2 sm:$0xff] %v1292_v1  ;;  %607 = vrot.lane.b32.xlu0 %v1319_v6, %s1133_s25 }
  0x82   : > { %v430_v35 = vld.sshfl [vmem:[#allocation1] sm:$0xff pattern:$0x75316420]  ;;  %v1411_v36 = vld.sshfl [vmem:[#allocation1 + $0x8] sm:$0xff pattern:$0x75316420] }
  0x83   : > { %452 = vst [vmem:[#allocation1] ss:$2 sm:$0xff] %v1312_v5 }
  0x88   : > { %646 = vrot.lane.b32.xlu1 %v1305_v3, %s1135_s7  ;;  %659 = vrot.lane.b32.xlu2 %v1319_v6, %s1135_s7  ;;  %v457_v37 = vld.sshfl [vmem:[#allocation1 + $0x10] sm:$0xff pattern:$0x75316420]  ;;  %v458_v38 = vld.sshfl [vmem:[#allocation1 + $0x18] sm:$0xff pattern:$0x75316420] }
  0x89   : > { %633 = vrot.lane.b32.xlu0 %v1319_v6, %s1134_s6 }
  0x8a   : > { %v456_v42 = vld.sshfl [vmem:[#allocation1 + $0x8] sm:$0xff pattern:$0x75316420]  ;;  %v455_v43 = vld.sshfl [vmem:[#allocation1] sm:$0xff pattern:$0x75316420] }
  0x90   : > { %685 = vrot.lane.b32.xlu1 %v1319_v6, %s1136_s9  ;;  %463 = vrot.lane.b32.xlu2 %v457_v37, %s1136_s9 }
  0x91   : > { %672 = vrot.lane.b32.xlu0 %v1305_v3, %s1136_s9 }
  0x98   : > { %361 = vrot.lane.b32.xlu1 %v355_v19, %s1132_s26  ;;  %363 = vrot.lane.b32.xlu2 %v356_v20, %s1132_s26 }
  0x99   : > { %465 = vrot.lane.b32.xlu0 %v458_v38, %s1136_s9 }
  0x9a   : > { %v1422_v39 = vpop.permute.xlu2 %544 }
  0x9b   : > { %v547_v5 = vrot.slane %v1422_v39, 4 }
  0xa0   : > { %389 = vrot.lane.b32.xlu1 %v382_v24, %s1133_s25  ;;  %412 = vrot.lane.b32.xlu2 %v406_v27, %s1134_s6 }
  0xa1   : > { %387 = vrot.lane.b32.xlu0 %v381_v23, %s1133_s25 }
  0xa2   : > { %v488_v40 = vpop.permute.xlu2 %487 }
  0xa3   : > { %v491_v53 = vrot.slane %v488_v40, 4 }
  0xa8   : > { %438 = vrot.lane.b32.xlu1 %v432_v31, %s1135_s7  ;;  %440 = vrot.lane.b32.xlu2 %v433_v32, %s1135_s7 }
  0xa9   : > { %414 = vrot.lane.b32.xlu0 %v407_v28, %s1134_s6 }
  0xaa   : > { %v1430_v41 = vpop.permute.xlu2 %503 }
  0xb0   : > { %285 = vrot.lane.b32.xlu2 %v1321_v7, %s1131_s23  ;;  %461 = vrot.lane.b32.xlu1 %v456_v42, %s1136_s9 }
  0xb1   : > { %459 = vrot.lane.b32.xlu0 %v455_v43, %s1136_s9  ;;  %s1077_s9 = scalar_lea.hbm %s1725_s4, 48 }
  0xb2   : > { %v519_v44 = vpop.permute.xlu1 %518  ;;  %v1436_v45 = vpop.permute.xlu2 %596 }
  0xb3   : > { %v490_v46 = vpop.permute.xlu0 %489  ;;  %v521_v59 = vrot.slane %v519_v44, 4  ;;  %v599_v28 = vrot.slane %v1436_v45, 4 }
  0xb4   : > { %v492_v54 = vrot.slane %v490_v46, 4 }
  0xb5   : > { %v524_v19 = vsel %vm314_vm2, %v519_v44, %v521_v59 }
  0xb6   : > { %v494_v60 = vsel %vm493_vm0, %v491_v53, %v492_v54  ;;  %v496_v7 = vsel %vm289_vm1, %v490_v46, %v492_v54 }
  0xb7   : > { %v495_v62 = vsel %vm289_vm1, %v488_v40, %v494_v60 }
  0xb8   : > { %312 = vrot.lane.b32.xlu2 %v1335_v12, %s1130_s20  ;;  %310 = vrot.lane.b32.xlu1 %v1333_v11, %s1130_s20 }
  0xb9   : > { %287 = vrot.lane.b32.xlu0 %v1323_v8, %s1131_s23  ;;  %v499_v8 = vadd.f32 %v495_v62, %v1305_v3 }
  0xba   : > { %v1444_v47 = vpop.permute.xlu1 %531  ;;  %v1446_v48 = vpop.permute.xlu2 %609 }
  0xbb   : > { %v1448_v49 = vpop.permute.xlu0 %505  ;;  %v534_v27 = vrot.slane %v1444_v47, 4 }
  0xbc   : > { %v508_v20 = vrot.slane %v1448_v49, 4 }
  0xc0   : > { %357 = vrot.lane.b32.xlu2 %v353_v25, %s1132_s26  ;;  %338 = vrot.lane.b32.xlu1 %v1351_v16, %s1129_s8 }
  0xc1   : > { %336 = vrot.lane.b32.xlu0 %v1349_v15, %s1129_s8  ;;  %v500_v15 = vadd.f32 %v496_v7, %v1290_v0 }
  0xc2   : > { %v1455_v50 = vpop.permute.xlu1 %570  ;;  %v1457_v51 = vpop.permute.xlu2 %568 }
  0xc3   : > { %v1459_v52 = vpop.permute.xlu0 %557  ;;  %v573_v3 = vrot.slane %v1455_v50, 4  ;;  %v528_v0 = vadd.f32 %v524_v19, %v500_v15 }
  0xc8   : > { %385 = vrot.lane.b32.xlu2 %v380_v30, %s1133_s25  ;;  %383 = vrot.lane.b32.xlu1 %v379_v29, %s1133_s25  ;;  %v576_v29 = vsel %vm365_vm4, %v1455_v50, %v573_v3  ;;  %v560_v30 = vrot.slane %v1459_v52, 4 }
  0xc9   : > { %359 = vrot.lane.b32.xlu0 %v1384_v26, %s1132_s26  ;;  %v550_v26 = vsel %vm340_vm3, %v1422_v39, %v547_v5  ;;  %s804_s26 = scalar_lea.sflag [#allocation5], %s1277_s29 }
  0xca   : > { %v1465_v55 = vpop.permute.xlu1 %583  ;;  %v1467_v56 = vpop.permute.xlu2 %581  ;;  %v554_v32 = vadd.f32 %v550_v26, %v528_v0  ;;  %v563_v37 = vsel %vm340_vm3, %v1459_v52, %v560_v30 }
  0xcb   : > { %v517_v57 = vpop.permute.xlu0 %516 }
  0xcc   : > { %v520_v58 = vrot.slane %v517_v57, 4 }
  0xce   : > { %v522_v61 = vsel %vm493_vm0, %v520_v58, %v521_v59 }
  0xcf   : > { %v523_v63 = vsel %vm314_vm2, %v517_v57, %v522_v61 }
  0xd0   : > { %434 = vrot.lane.b32.xlu2 %v430_v35, %s1135_s7  ;;  %410 = vrot.lane.b32.xlu1 %v405_v34, %s1134_s6  ;;  %v527_v11 = vadd.f32 %v523_v63, %v499_v8  ;;  %v586_v34 = vrot.slane %v1465_v55, 4 }
  0xd1   : > { %408 = vrot.lane.b32.xlu0 %v1402_v33, %s1134_s6  ;;  %v537_v33 = vsel %vm314_vm2, %v1444_v47, %v534_v27 }
  0xd2   : > { %v543_v1 = vpop.permute.xlu1 %542  ;;  %v1477_v4 = vpop.permute.xlu2 %674 }
  0xd3   : > { %v546_v9 = vrot.slane %v543_v1, 4  ;;  %v1482_v10 = vpop.permute.xlu0 %529  ;;  %v677_v47 = vrot.slane %v1477_v4, 4 }
  0xd5   : > { %v548_v12 = vsel %vm493_vm0, %v546_v9, %v547_v5  ;;  %v680_v60 = vsel %vm467_vm8, %v1477_v4, %v677_v47 }
  0xd6   : > { %v549_v16 = vsel %vm340_vm3, %v543_v1, %v548_v12 }
  0xd7   : > { %v1489_v23 = vadd.f32 %v549_v16, %v527_v11  ;;  %v507_v11 = vrot.slane %v1430_v41, 4  ;;  %v533_v16 = vrot.slane %v1482_v10, 4 }
  0xd8   : > { %283 = vrot.lane.b32.xlu2 %v1346_v14, %s1131_s23  ;;  %281 = vrot.lane.b32.xlu1 %v1344_v13, %s1131_s23  ;;  %v511_v13 = vsel %vm289_vm1, %v1448_v49, %v508_v20 }
  0xd9   : > { %436 = vrot.lane.b32.xlu0 %v1411_v36, %s1135_s7  ;;  %v515_v31 = vadd.f32 %v511_v13, %v1303_v2  ;;  %v580_v36 = vadd.f32 %v576_v29, %v554_v32  ;;  %v602_v2 = vsel %vm391_vm5, %v1436_v45, %v599_v28  ;;  %v509_v26 = vsel %vm493_vm0, %v507_v11, %v508_v20 }
  0xda   : > { %v1498_v24 = vpop.permute.xlu1 %555  ;;  %v1500_v25 = vpop.permute.xlu2 %687  ;;  %v572_v20 = vrot.slane %v1457_v51, 4 }
  0xdb   : > { %v1509_v14 = vpop.permute.xlu0 %622  ;;  %v541_v38 = vadd.f32 %v537_v33, %v515_v31  ;;  %v606_v46 = vadd.f32 %v602_v2, %v580_v36  ;;  %v690_v61 = vrot.slane %v1500_v25, 4  ;;  %v559_v13 = vrot.slane %v1498_v24, 4 }
  0xdc   : > { %v625_v35 = vrot.slane %v1509_v14, 4  ;;  %v535_v33 = vsel %vm493_vm0, %v533_v16, %v534_v27  ;;  %v510_v2 = vsel %vm289_vm1, %v1430_v41, %v509_v26 }
  0xdd   : > { %v567_v44 = vadd.f32 %v563_v37, %v541_v38  ;;  %v693_v12 = vsel %vm467_vm8, %v1500_v25, %v690_v61  ;;  %v561_v37 = vsel %vm493_vm0, %v559_v13, %v560_v30  ;;  %v536_v49 = vsel %vm314_vm2, %v1482_v10, %v535_v33 }
  0xde   : > { %v628_v42 = vsel %vm416_vm6, %v1509_v14, %v625_v35  ;;  %v585_v38 = vrot.slane %v1467_v56, 4  ;;  %v574_v10 = vsel %vm493_vm0, %v572_v20, %v573_v3 }
  0xdf   : > { %v632_v57 = vadd.f32 %v628_v42, %v606_v46  ;;  %v562_v42 = vsel %vm340_vm3, %v1498_v24, %v561_v37  ;;  %v575_v3 = vsel %vm365_vm4, %v1457_v51, %v574_v10 }
  0xe0   : > { %308 = vrot.lane.b32.xlu1 %v1362_v18, %s1130_s20  ;;  %332 = vrot.lane.b32.xlu2 %v1372_v21, %s1129_s8  ;;  %v612_v18 = vrot.slane %v1446_v48, 4  ;;  %v589_v21 = vsel %vm365_vm4, %v1465_v55, %v586_v34  ;;  %v587_v30 = vsel %vm493_vm0, %v585_v38, %v586_v34 }
  0xe1   : > { %306 = vrot.lane.b32.xlu0 %v1360_v17, %s1130_s20  ;;  %v593_v54 = vadd.f32 %v589_v21, %v567_v44  ;;  %v514_v21 = vadd.f32 %v510_v2, %v1319_v6  ;;  %v588_v34 = vsel %vm365_vm4, %v1467_v56, %v587_v30  ;;  %s817_s20 = sshll.u32 %s255_s22, 4  ;;  %s818_s20 = int_to_ptr.vmem [resolvable:$true] %s817_s20 }
  0xe2   : > { %v1534_v39 = vpop.permute.xlu1 %648  ;;  %v1536_v40 = vpop.permute.xlu2 %659  ;;  %v615_v58 = vsel %vm391_vm5, %v1446_v48, %v612_v18 }
  0xe3   : > { %v651_v17 = vrot.slane %v1534_v39, 4  ;;  %v1548_v43 = vpop.permute.xlu0 %635  ;;  %v619_v63 = vadd.f32 %v615_v58, %v593_v54  ;;  %v540_v44 = vadd.f32 %v536_v49, %v514_v21 }
  0xe4   : > { %v638_v53 = vrot.slane %v1548_v43, 4 }
  0xe5   : > { %v654_v52 = vsel %vm442_vm7, %v1534_v39, %v651_v17  ;;  %v566_v54 = vadd.f32 %v562_v42, %v540_v44 }
  0xe6   : > { %v658_v59 = vadd.f32 %v654_v52, %v632_v57  ;;  %v641_v62 = vsel %vm416_vm6, %v1548_v43, %v638_v53 }
  0xe7   : > { %v645_v9 = vadd.f32 %v641_v62, %v619_v63  ;;  %v579_v62 = vadd.f32 %v575_v3, %v1489_v23  ;;  %v592_v63 = vadd.f32 %v588_v34, %v566_v54 }
  0xe8   : > { %v684_v8 = vadd.f32 %v680_v60, %v658_v59 }
  0xe9   : > { %334 = vrot.lane.b32.xlu0 %v1374_v22, %s1129_s8  ;;  %s815_s8 = scalar_lea.hbm %s1725_s4, %s934_s14 }
  0xea   : > { %v1567_v1 = vpop.permute.xlu1 %661  ;;  %v1569_v5 = vpop.permute.xlu2 %463  ;;  %v699_v19 = vmul.f32 %v684_v8, %v684_v8  ;;  %s819_s23 = sshll.u32 %s815_s8, 4  ;;  %s820_s23 = int_to_ptr.hbm [resolvable:$true] %s819_s23 }
  0xeb   : > { %v664_v48 = vrot.slane %v1567_v1, 4  ;;  %v595_v7 = vpop.permute.xlu0 %594  ;;  %s1071_s25 = sshra.s32 %s820_s23, 4  ;;  %s1072_s25 = int_to_ptr.hbm [resolvable:$true] %s1071_s25 }
  0xec   : > { %v598_v27 = vrot.slane %v595_v7, 4  ;;  %s1073_s6 = scalar_lea.hbm %s1072_s25, 24  ;;  %p1078_p10 = scmp.lt.s32.totalorder %s1072_s25, %s1725_s4 }
  0xed   : > { %v667_v22 = vsel %vm442_vm7, %v1567_v1, %v664_v48  ;;  %p1074_p6 = scmp.ne.s32.totalorder %s1072_s25, %s1073_s6  ;;  %p1079_p2 = scmp.lt.s32.totalorder %s1077_s9, %s1073_s6 }
  0xee   : > { %v671_v15 = vadd.f32 %v667_v22, %v645_v9  ;;  %v600_v24 = vsel %vm493_vm0, %v598_v27, %v599_v28 }
  0xef   : > { %v601_v45 = vsel %vm391_vm5, %v595_v7, %v600_v24  ;;  %p1075_p13 = pnand %p1074_p6, %p1213_p11  ;;  %p1080_p9 = por %p1079_p2, %p1078_p10 }
  0xf0   : > { %v697_v0 = vadd.f32 %v693_v12, %v671_v15 }
  0xf1   : > { %p1076_p3 = pneg %p1075_p13 }
  0xf2   : > { %v701_v29 = vadd.f32 %v699_v19, %v697_v0  ;;  %v621_v31 = vpop.permute.xlu1 %620  ;;  %v1584_v32 = vpop.permute.xlu2 %363 }
  0xf3   : > { %v608_v36 = vpop.permute.xlu0 %607  ;;  %v624_v46 = vrot.slane %v621_v31, 4  ;;  %p1081_p0 = pnand %p1080_p9, %p1076_p3 }
  0xf4   : > { %707 = vst [vmem:[#allocation1 + $0x11] ss:$2 sm:$0xff] %v701_v29  ;;  %v611_v43 = vrot.slane %v608_v36, 4 }
  0xf5   : > { %v626_v50 = vsel %vm493_vm0, %v624_v46, %v625_v35 }
  0xf6   : > { %v613_v58 = vsel %vm493_vm0, %v611_v43, %v612_v18  ;;  %v663_v18 = vrot.slane %v1536_v40, 4  ;;  %v627_v35 = vsel %vm416_vm6, %v621_v31, %v626_v50 }
  0xf7   : > { %v614_v28 = vsel %vm391_vm5, %v608_v36, %v613_v58 }
  0xf8   : > { %v618_v1 = vadd.f32 %v614_v28, %v592_v63  ;;  %v665_v12 = vsel %vm493_vm0, %v663_v18, %v664_v48 }
  0xf9   : > { %v666_v19 = vsel %vm442_vm7, %v1536_v40, %v665_v12 }
  0xfa   : > { %v647_v41 = vpop.permute.xlu1 %646  ;;  %v1597_v52 = vpop.permute.xlu2 %412 }
  0xfb   : > { %v634_v6 = vpop.permute.xlu0 %633  ;;  %v710_v57 = vld.sshfl [vmem:[#allocation1 + $0x10] sm:$0xff pattern:$0x75316420]  ;;  %v650_v59 = vrot.slane %v647_v41, 4 }
  0xfc   : > { %v637_v60 = vrot.slane %v634_v6, 4  ;;  %716 = vst [vmem:[#allocation2 + $0x28] sm:$0xf0] %v710_v57 }
  0xfd   : > { %v652_v14 = vsel %vm493_vm0, %v650_v59, %v651_v17 }
  0xfe   : > { %v639_v55 = vsel %vm493_vm0, %v637_v60, %v638_v53  ;;  %v605_v53 = vadd.f32 %v601_v45, %v579_v62  ;;  %v653_v7 = vsel %vm442_vm7, %v647_v41, %v652_v14 }
  0xff   : > { %v640_v51 = vsel %vm416_vm6, %v634_v6, %v639_v55 }
 0x100   : > { %v631_v23 = vadd.f32 %v627_v35, %v605_v53  ;;  %v644_v22 = vadd.f32 %v640_v51, %v618_v1 }
 0x102   : > { %v686_v56 = vpop.permute.xlu1 %685  ;;  %v441_v8 = vpop.permute.xlu2 %440  ;;  %v657_v17 = vadd.f32 %v653_v7, %v631_v23  ;;  %v670_v48 = vadd.f32 %v666_v19, %v644_v22 }
 0x103   : > { %v689_v9 = vrot.slane %v686_v56, 4  ;;  %v673_v11 = vpop.permute.xlu0 %672 }
 0x104   : > { %v676_v15 = vrot.slane %v673_v11, 4 }
 0x105   : > { %v691_v39 = vsel %vm493_vm0, %v689_v9, %v690_v61 }
 0x106   : > { %v678_v16 = vsel %vm493_vm0, %v676_v15, %v677_v47  ;;  %v692_v0 = vsel %vm467_vm8, %v686_v56, %v691_v39  ;;  %v741_v39 = vld [vmem:[%s1723_s2] sm:$0xf] }
 0x107   : > { %v679_v26 = vsel %vm467_vm8, %v673_v11, %v678_v16  ;;  %v696_v29 = vadd.f32 %v692_v0, %v670_v48 }
 0x108   : > { %v683_v13 = vadd.f32 %v679_v26, %v657_v17 }
 0x10a   : > { %v698_v31 = vmul.f32 %v683_v13, %v683_v13  ;;  %v1638_v33 = vpop.permute.xlu1 %361  ;;  %v286_v25 = vpop.permute.xlu2 %285 }
 0x10b   : > { %v368_v4 = vsel %vm365_vm4, %v1638_v33, %v1584_v32  ;;  %v466_v61 = vpop.permute.xlu0 %465 }
 0x10c   : > { %v700_v47 = vadd.f32 %v698_v31, %v696_v29  ;;  %374 = vst [vmem:[#allocation2 + $0x40] sm:$0xf] %v368_v4  ;;  %v470_v40 = vsel %vm467_vm8, %v1569_v5, %v466_v61  ;;  %v742_v29 = vld [vmem:[%s1724_s3] sm:$0xff] }
 0x10d   : > { %476 = vst [vmem:[#allocation2 + $0x28] sm:$0xf] %v470_v40 }
 0x10e   : > { %705 = vst [vmem:[#allocation1 + $0x1] ss:$2 sm:$0xff] %v700_v47 }
 0x112   : > { %v390_v36 = vpop.permute.xlu1 %389  ;;  %v313_v2 = vpop.permute.xlu2 %312 }
 0x113   : > { %v388_v37 = vpop.permute.xlu0 %387 }
 0x114   : > { %v394_v49 = vsel %vm391_vm5, %v388_v37, %v390_v36  ;;  %v731_v20 = vld [vmem:[#allocation2 + $0x28] sm:$0xff] }
 0x115   : > { %400 = vst [vmem:[#allocation2 + $0x40] sm:$0xf0] %v394_v49  ;;  %v740_v38 = vpack.c.bf16 %v731_v20, %v731_v20  ;;  %v708_v21 = vld.sshfl [vmem:[#allocation1] sm:$0xff pattern:$0x75316420] }
 0x116   : > { %714 = vst [vmem:[#allocation2 + $0x60] sm:$0xf0] %v708_v21  ;;  %v709_v42 = vld.sshfl [vmem:[#allocation1 + $0x8] sm:$0xff pattern:$0x75316420] }
 0x117   : > { %v759_v32 = vsel %vm493_vm0, %v740_v38, 0  ;;  %715 = vst [vmem:[#allocation2 + $0x70] sm:$0xf0] %v709_v42 }
 0x118   : > { %792 = vmatpush.bf16.msra.mxu2 %v759_v32 }
 0x11a   : > { %v1647_v27 = vpop.permute.xlu1 %438  ;;  %v358_v43 = vpop.permute.xlu2 %357 }
 0x11b   : > { %v445_v44 = vsel %vm442_vm7, %v1647_v27, %v441_v8  ;;  %v415_v46 = vpop.permute.xlu0 %414 }
 0x11c   : > { %451 = vst [vmem:[#allocation2 + $0x38] sm:$0xf0] %v445_v44  ;;  %v419_v41 = vsel %vm416_vm6, %v1597_v52, %v415_v46  ;;  %v725_v58 = vld [vmem:[#allocation2 + $0x40] sm:$0xff] }
 0x11d   : > { %425 = vst [vmem:[#allocation2 + $0x38] sm:$0xf] %v419_v41 }
 0x122   : > { %v386_v10 = vpop.permute.xlu2 %385  ;;  %v462_v30 = vpop.permute.xlu1 %461 }
 0x123   : > { %v393_v54 = vsel %vm391_vm5, %v386_v10, %v388_v37  ;;  %v469_v6 = vsel %vm467_vm8, %v462_v30, %v1569_v5  ;;  %v460_v57 = vpop.permute.xlu0 %459 }
 0x124   : > { %399 = vst [vmem:[#allocation2 + $0x48] sm:$0xf0] %v393_v54  ;;  %v468_v24 = vsel %vm467_vm8, %v460_v57, %v462_v30  ;;  %v728_v59 = vld [vmem:[#allocation2 + $0x38] sm:$0xff] }
 0x125   : > { %475 = vst [vmem:[#allocation2 + $0x70] sm:$0xf] %v469_v6  ;;  %v737_v60 = vpack.c.bf16 %v728_v59, %v725_v58 }
 0x126   : > { %474 = vst [vmem:[#allocation2 + $0x60] sm:$0xf] %v468_v24 }
 0x127   : > { %793 = vmatpush.bf16.msra.mxu2 %v737_v60 }
 0x12a   : > { %v435_v50 = vpop.permute.xlu2 %434  ;;  %v311_v55 = vpop.permute.xlu1 %310 }
 0x12b   : > { %v317_v3 = vsel %vm314_vm2, %v311_v55, %v313_v2  ;;  %v288_v34 = vpop.permute.xlu0 %287 }
 0x12c   : > { %323 = vst [vmem:[#allocation2 + $0x68] sm:$0xf] %v317_v3  ;;  %v292_v45 = vsel %vm289_vm1, %v286_v25, %v288_v34  ;;  %v730_v28 = vld [vmem:[#allocation2 + $0x70] sm:$0xff] }
 0x12d   : > { %298 = vst [vmem:[#allocation2 + $0x58] sm:$0xf0] %v292_v45  ;;  %v729_v5 = vld [vmem:[#allocation2 + $0x60] sm:$0xff]  ;;  %v739_v18 = vpack.c.bf16 %v730_v28, %v730_v28 }
 0x12e   : > { %v738_v62 = vpack.c.bf16 %v729_v5, %v729_v5 }
 0x12f   : > { %v756_v63 = vsel %vm493_vm0, %v739_v18, 0 }
 0x130   : > { %v753_v14 = vsel %vm493_vm0, %v738_v62, 0  ;;  %779 = vmatpush.bf16.msra.mxu1 %v756_v63 }
 0x131   : > { %766 = vmatpush.bf16.msra.mxu0 %v753_v14 }
 0x132   : > { %v284_v35 = vpop.permute.xlu2 %283  ;;  %v339_v51 = vpop.permute.xlu1 %338 }
 0x133   : > { %v291_v53 = vsel %vm289_vm1, %v284_v35, %v286_v25  ;;  %v337_v1 = vpop.permute.xlu0 %336 }
 0x134   : > { %297 = vst [vmem:[#allocation2] sm:$0xf0] %v291_v53  ;;  %v343_v56 = vsel %vm340_vm3, %v337_v1, %v339_v51  ;;  %v719_v23 = vld [vmem:[#allocation2 + $0x58] sm:$0xff] }
 0x135   : > { %349 = vst [vmem:[#allocation2 + $0x68] sm:$0xf0] %v343_v56 }
 0x13a   : > { %v384_v8 = vpop.permute.xlu1 %383  ;;  %v333_v38 = vpop.permute.xlu2 %332 }
 0x13b   : > { %v392_v7 = vsel %vm391_vm5, %v384_v8, %v386_v10  ;;  %v360_v9 = vpop.permute.xlu0 %359  ;;  %v718_v46 = vld [vmem:[#allocation2] sm:$0xff] }
 0x13c   : > { %398 = vst [vmem:[#allocation2 + $0x8] sm:$0xf0] %v392_v7  ;;  %v366_v11 = vsel %vm365_vm4, %v358_v43, %v360_v9  ;;  %v367_v12 = vsel %vm365_vm4, %v360_v9, %v1638_v33  ;;  %v722_v22 = vld [vmem:[#allocation2 + $0x68] sm:$0xff] }
 0x13d   : > { %372 = vst [vmem:[#allocation2 + $0x8] sm:$0xf] %v366_v11  ;;  %v734_v15 = vpack.c.bf16 %v722_v22, %v719_v23 }
 0x13e   : > { %373 = vst [vmem:[#allocation2 + $0x48] sm:$0xf] %v367_v12 }
 0x13f   : > { %794 = vmatpush.bf16.msra.mxu2 %v734_v15 }
 0x142   : > { %v411_v17 = vpop.permute.xlu1 %410  ;;  %927 = vmatmul.msk.bf16.vlgmr.msra.gmra.mxu2 %vm748_vm9, %v741_v39 }
 0x143   : > { %v418_v16 = vsel %vm416_vm6, %v411_v17, %v1597_v52  ;;  %v409_v19 = vpop.permute.xlu0 %408  ;;  %v1137_v52 = vmov 0  }
 0x144   : > { %424 = vst [vmem:[#allocation2 + $0x10] sm:$0xf] %v418_v16  ;;  %v417_v0 = vsel %vm416_vm6, %v409_v19, %v411_v17  ;;  %995 = vset.pattern.permute.xlu1 %v1137_v52  ;;  %996 = vset.pattern.permute.xlu0 %v1137_v52  ;;  %v723_v40 = vld [vmem:[#allocation2 + $0x8] sm:$0xff] }
 0x145   : > { %423 = vst [vmem:[#allocation2 + $0x20] sm:$0xf] %v417_v0  ;;  %745 = vperm.xlu1 %995, %v742_v29   ;;  %v724_v37 = vld [vmem:[#allocation2 + $0x48] sm:$0xff] }
 0x14a   : > { %v282_v26 = vpop.permute.xlu1 %281 }
 0x14b   : > { %v290_v48 = vsel %vm289_vm1, %v282_v26, %v284_v35  ;;  %v437_v13 = vpop.permute.xlu0 %436 }
 0x14c   : > { %296 = vst [vmem:[#allocation2 + $0x30] sm:$0xf0] %v290_v48  ;;  %v443_v31 = vsel %vm442_vm7, %v435_v50, %v437_v13  ;;  %v444_v33 = vsel %vm442_vm7, %v437_v13, %v1647_v27 }
 0x14d   : > { %449 = vst [vmem:[#allocation2 + $0x20] sm:$0xf0] %v443_v31 }
 0x14e   : > { %450 = vst [vmem:[#allocation2 + $0x10] sm:$0xf0] %v444_v33 }
 0x152   : > { %v309_v25 = vpop.permute.xlu1 %308 }
 0x153   : > { %v316_v4 = vsel %vm314_vm2, %v309_v25, %v311_v55  ;;  %v307_v61 = vpop.permute.xlu0 %306  ;;  %v717_v27 = vld [vmem:[#allocation2 + $0x30] sm:$0xff] }
 0x154   : > { %322 = vst [vmem:[#allocation2 + $0x50] sm:$0xf] %v316_v4  ;;  %v315_v47 = vsel %vm314_vm2, %v307_v61, %v309_v25  ;;  %v726_v36 = vld [vmem:[#allocation2 + $0x20] sm:$0xff] }
 0x155   : > { %321 = vst [vmem:[#allocation2 + $0x18] sm:$0xf] %v315_v47  ;;  %v735_v2 = vpack.c.bf16 %v726_v36, %v723_v40  ;;  %v727_v49 = vld [vmem:[#allocation2 + $0x10] sm:$0xff] }
 0x156   : > { %v736_v20 = vpack.c.bf16 %v727_v49, %v724_v37 }
 0x157   : > { %767 = vmatpush.bf16.msra.mxu0 %v735_v2 }
 0x158   : > { %780 = vmatpush.bf16.msra.mxu1 %v736_v20 }
 0x15b   : > { %v335_v21 = vpop.permute.xlu0 %334 }
 0x15c   : > { %v341_v42 = vsel %vm340_vm3, %v333_v38, %v335_v21  ;;  %v342_v32 = vsel %vm340_vm3, %v335_v21, %v337_v1 }
 0x15d   : > { %347 = vst [vmem:[#allocation2 + $0x18] sm:$0xf0] %v341_v42 }
 0x15e   : > { %348 = vst [vmem:[#allocation2 + $0x50] sm:$0xf0] %v342_v32 }
 0x164   : > { %v720_v43 = vld [vmem:[#allocation2 + $0x18] sm:$0xff] }
 0x165   : > { %v732_v44 = vpack.c.bf16 %v720_v43, %v717_v27  ;;  %v721_v41 = vld [vmem:[#allocation2 + $0x50] sm:$0xff] }
 0x166   : > { %v733_v10 = vpack.c.bf16 %v721_v41, %v718_v46 }
 0x167   : > { %768 = vmatpush.bf16.msra.mxu0 %v732_v44 }
 0x168   : > { %781 = vmatpush.bf16.msra.mxu1 %v733_v10 }
 0x16a   : > { %925 = vmatmul.msk.bf16.vlgmr.msra.gmra.mxu0 %vm748_vm9, %v741_v39 }
 0x16b   : > { %926 = vmatmul.msk.bf16.vlgmr.msra.gmra.mxu1 %vm748_vm9, %v741_v39 }
 0x1b7   : > { %v746_v30 = vpop.permute.xlu1 %745 }
 0x1c5   : > { %v796_v54 = vpop.f32.mrf.mxu2 }
 0x1c6   : > { %v797_v6 = vadd.f32 %v796_v54, %v746_v30 }
 0x1c8   : > { %802 = vst [vmem:[%s255_s22 + $0x10] sm:$0xff] %v797_v6 }
 0x1cd   : > { %v798_v57 = vpop.f32.mrf.mxu2 }
 0x1e7   : > { %v770_v24 = vpop.f32.mrf.mxu0 }
 0x1e8   : > { %v771_v58 = vadd.f32 %v770_v24, %v746_v30  ;;  %v783_v59 = vpop.f32.mrf.mxu1 }
 0x1e9   : > { %v784_v60 = vadd.f32 %v783_v59, %v746_v30 }
 0x1ea   : > { %800 = vst [vmem:[%s255_s22] sm:$0xff] %v771_v58 }
 0x1eb   : > { %801 = vst [vmem:[%s255_s22 + $0x8] sm:$0xff] %v784_v60 }
 0x1ec   : > { %1084 = shalt.err (!%p1081_p0)
}
 0x1ed   : > { %939 = dma.vmem_to_hbm [thread:$0]  (%p1213_p11), %s818_s20, 384, %s820_s23, %s804_s26  }
 0x1ef   : > { %v772_v50 = vpop.f32.mrf.mxu0 }
 0x1f0   : > { %v785_v55 = vpop.f32.mrf.mxu1 }
 0x1f1 PF: > { %s831_s29 = sand.u32 1, %s1115_s15   ;;  %p1734_p1 = scmp.ge.s32.totalorder %s1127_s18, 2 }
 0x1f2   : > { %s832_s10 = scalar_lea.sflag [#allocation5], %s831_s29 }
 0x1f3   : > { %p949_p4 = pnand %p1734_p1, %p1217_p12 }
 0x1f5   : > { %p950_p7 = pneg %p949_p4 }
 0x1f7   : > { %1110 = dma.done.wait (%p950_p7), %s832_s10, 384  }
 0x1f8   : > { %1112 = vsyncadd (%p950_p7), %s832_s10, 4294966912  ;;  %p20_p11 = scmp.ge.s32.totalorder %s1188_s21, 4   ;;  %s1735_s15 = smov %s1119_s16 }
 0x1f9   : > { %s1736_s16 = smov %s1123_s17  ;;  %s1737_s17 = smov %s1200_s24 }
 0x1fa   : > { %s1738_s18 = smov %s1188_s21  ;;  %22 = sbr.rel (!%p20_p11) target bundleno = 9 (0x9), region = 109 }
 0x1ff   :  { %838 = vsyncpa [#allocation4], 1 }
 0x200   :  { %840 = vsyncpa [#allocation4 + $0x1], 1 }
 0x201   :  { %841 = vsyncpa [#allocation7], 1 }
 0x202   :  { %843 = vsyncpa [#allocation7 + $0x1], 1 }
 0x203   :  { %844 = vsyncpa [#allocation5], 1 }
 0x204   :  { %846 = vsyncpa [#allocation5 + $0x1], 1 }

</bundles_post_ra>
